<compile_context>
chip_gen: v5e
topology: v5e:2x2
jax: 0.10.0
libtpu: 0.0.40
codegen_flags: <defaults>
</compile_context>

<pallas_src>
from functools import partial

import jax
import jax.numpy as jnp
from jax import lax
from jax.experimental import pallas as pl
from jax.experimental.pallas import tpu as pltpu

_LANE = 128
_SUBLANE = 8

# ~4 MiB per input VMEM buffer (byte-based, dtype-independent).  Large enough to
# amortize the ~0.35 us per-grid-step overhead even at v7x's 3.2 TB/s HBM,
# small enough that 2 inputs x 2 pipeline buffers (~16 MiB) + tiny f32 partial
# output stays well inside the 32 MiB VMEM limit on v5e/v6e/v7x.
_TARGET_BLOCK_BYTES = 4 * 1024 * 1024
# Lane-dense last-dim candidates (big multiples of 128 -> unmasked vst runs).
_LANE_CANDIDATES = (4096, 2048, 1024, 512, 256, 128)
_VMEM_LIMIT_BYTES = 32 * 1024 * 1024


# ---------------------------------------------------------------------------
# Kernels
# ---------------------------------------------------------------------------
def _welsch_map_kernel(a_ref, b_ref, o_ref, *, scale, neg_inv_two_alpha2):
    """Elementwise robust (Welsch) distance on one (block_rows, lanes) tile."""
    a = a_ref[...].astype(jnp.float32)
    b = b_ref[...].astype(jnp.float32)
    d = a - b
    # scale * (1 - exp(-d^2 / (2*alpha^2))); divide folded into a compile-time
    # constant: sub, mul, mul, exp (EUP), sub, mul — all VPU/EUP, mem-bound.
    loss = scale * (1.0 - jnp.exp((d * d) * neg_inv_two_alpha2))
    o_ref[...] = loss.astype(o_ref.dtype)


def _welsch_partial_sum_kernel(a_ref, b_ref, o_ref, *, scale, neg_inv_two_alpha2,
                               valid_rows, block_rows):
    """Fused distance + per-lane partial sum: writes one (1, lanes) f32 row."""
    a = a_ref[...].astype(jnp.float32)
    b = b_ref[...].astype(jnp.float32)
    d = a - b
    loss = scale * (1.0 - jnp.exp((d * d) * neg_inv_two_alpha2))
    if valid_rows % block_rows != 0:
        # Ragged last block: rows past `valid_rows` hold unspecified data, so
        # mask them out of the reduction (cheap VPU work on a mem-bound tile).
        row0 = pl.program_id(0) * block_rows
        row_ids = row0 + lax.broadcasted_iota(jnp.int32, loss.shape, 0)
        loss = jnp.where(row_ids < valid_rows, loss, 0.0)
    # Sublane reduce to per-lane partial sums; final (tiny) sum happens outside.
    o_ref[...] = jnp.sum(loss, axis=0, keepdims=True)


# ---------------------------------------------------------------------------
# Tiling helpers
# ---------------------------------------------------------------------------
def _choose_lanes(n):
    """Widest lane-dense last dim that divides n exactly (None if n % 128 != 0)."""
    for lanes in _LANE_CANDIDATES:
        if n % lanes == 0:
            return lanes
    return None


def _balanced_block_rows(rows, lanes, itemsize):
    """Byte-based, balanced block rows (multiple of the sublane count)."""
    target_rows = max(_SUBLANE,
                      (_TARGET_BLOCK_BYTES // (lanes * itemsize)) // _SUBLANE * _SUBLANE)
    if rows <= target_rows:
        return rows, 1
    num_blocks = pl.cdiv(rows, target_rows)
    block_rows = pl.cdiv(rows, num_blocks)                       # even out blocks
    block_rows = ((block_rows + _SUBLANE - 1) // _SUBLANE) * _SUBLANE
    num_blocks = pl.cdiv(rows, block_rows)
    return block_rows, num_blocks


def _compiler_params():
    return pltpu.CompilerParams(
        dimension_semantics=("parallel",),   # shards grid across v7x's 2 TCs
        vmem_limit_bytes=_VMEM_LIMIT_BYTES,
    )


# ---------------------------------------------------------------------------
# Public entry points
# ---------------------------------------------------------------------------
@partial(jax.jit, static_argnames=("alpha", "weight"))
def welsch_loss_map(img1, img2, alpha=0.1, weight=1.0):
    """Per-element robust distance map, shaped like the inputs (Pallas kernel).

    Kept only for callers that actually need the full map; the scalar loss path
    uses the fused-reduction kernel below (half the HBM traffic).
    """
    assert img1.shape == img2.shape, "inputs must have identical shapes"
    assert float(alpha) != 0.0, "alpha must be non-zero"
    alpha2 = float(alpha) * float(alpha)
    scale = float(weight) * alpha2          # weight folded into the constant
    neg_inv_two_alpha2 = -0.5 / alpha2      # divide -> compile-time multiply

    orig_shape = img1.shape
    out_dtype = jnp.result_type(img1.dtype, img2.dtype)
    if not jnp.issubdtype(out_dtype, jnp.floating):
        out_dtype = jnp.float32             # never truncate a fractional loss

    n = img1.size
    a_flat = img1.reshape(-1)
    b_flat = img2.reshape(-1)

    lanes = _choose_lanes(n)
    pad = 0
    if lanes is None:
        # TODO(synk): rare unaligned tail (n % 128 != 0) keeps the pad fallback
        # only for the map API; the scalar-loss path never pads.
        lanes = _LANE
        rows = pl.cdiv(n, lanes)
        pad = rows * lanes - n
        a_flat = jnp.pad(a_flat, (0, pad))
        b_flat = jnp.pad(b_flat, (0, pad))
    rows = (n + pad) // lanes
    a2 = a_flat.reshape(rows, lanes)
    b2 = b_flat.reshape(rows, lanes)

    itemsize = max(jnp.dtype(img1.dtype).itemsize,
                   jnp.dtype(img2.dtype).itemsize,
                   jnp.dtype(out_dtype).itemsize)
    block_rows, num_blocks = _balanced_block_rows(rows, lanes, itemsize)

    out2 = pl.pallas_call(
        partial(_welsch_map_kernel, scale=scale,
                neg_inv_two_alpha2=neg_inv_two_alpha2),
        out_shape=jax.ShapeDtypeStruct((rows, lanes), out_dtype),
        grid=(num_blocks,),
        in_specs=[
            pl.BlockSpec((block_rows, lanes), lambda i: (i, 0)),
            pl.BlockSpec((block_rows, lanes), lambda i: (i, 0)),
        ],
        out_specs=pl.BlockSpec((block_rows, lanes), lambda i: (i, 0)),
        compiler_params=_compiler_params(),
    )(a2, b2)

    out_flat = out2.reshape(-1)
    if pad:
        out_flat = out_flat[:n]
    return out_flat.reshape(orig_shape)


@partial(jax.jit, static_argnames=("loss_weight", "alpha"))
def lpips_loss(pred, target, loss_weight=1.0, alpha=0.1):
    """Module-level forward: loss_weight * distance(pred, target).mean() -> f32 scalar.

    The mean is fused into the kernel: each grid step emits an f32 per-lane
    partial sum, so only ~2N elements cross HBM (no full-size map writeback).
    """
    assert pred.shape == target.shape, "inputs must have identical shapes"
    assert float(alpha) != 0.0, "alpha must be non-zero"
    alpha2 = float(alpha) * float(alpha)
    scale = float(loss_weight) * alpha2     # loss_weight folded (linear in mean)
    neg_inv_two_alpha2 = -0.5 / alpha2

    n = pred.size
    a_flat = pred.reshape(-1)
    b_flat = target.reshape(-1)

    lanes = _choose_lanes(n)
    tail_sum = jnp.float32(0.0)
    if lanes is None:
        # Rare n % 128 != 0: kernel handles the 128-aligned prefix; the <128-elem
        # tail is reduced in plain f32 jnp (no full-size jnp.pad copies).
        n_main = (n // _LANE) * _LANE
        ta = a_flat[n_main:].astype(jnp.float32)
        tb = b_flat[n_main:].astype(jnp.float32)
        td = ta - tb
        tail_sum = jnp.sum(scale * (1.0 - jnp.exp((td * td) * neg_inv_two_alpha2)),
                           dtype=jnp.float32)
        a_flat = a_flat[:n_main]
        b_flat = b_flat[:n_main]
        lanes = _LANE
        n_kernel = n_main
    else:
        n_kernel = n

    if n_kernel == 0:
        return tail_sum / n

    rows = n_kernel // lanes
    a2 = a_flat.reshape(rows, lanes)
    b2 = b_flat.reshape(rows, lanes)

    itemsize = max(jnp.dtype(pred.dtype).itemsize, jnp.dtype(target.dtype).itemsize)
    block_rows, num_blocks = _balanced_block_rows(rows, lanes, itemsize)

    partials = pl.pallas_call(
        partial(_welsch_partial_sum_kernel, scale=scale,
                neg_inv_two_alpha2=neg_inv_two_alpha2,
                valid_rows=rows, block_rows=block_rows),
        out_shape=jax.ShapeDtypeStruct((num_blocks, lanes), jnp.float32),
        grid=(num_blocks,),
        in_specs=[
            pl.BlockSpec((block_rows, lanes), lambda i: (i, 0)),
            pl.BlockSpec((block_rows, lanes), lambda i: (i, 0)),
        ],
        out_specs=pl.BlockSpec((1, lanes), lambda i: (i, 0)),
        compiler_params=_compiler_params(),
    )(a2, b2)

    total = jnp.sum(partials, dtype=jnp.float32) + tail_sum   # f32 accumulation
    return total / n


# ---------------------------------------------------------------------------
# Pure-JAX reference
# ---------------------------------------------------------------------------
def _reference_map(img1, img2, alpha=0.1, weight=1.0):
    alpha2 = alpha * alpha
    d = img1.astype(jnp.float32) - img2.astype(jnp.float32)
    return weight * alpha2 * (1.0 - jnp.exp(-(d * d) / (2.0 * alpha2)))


if __name__ == "__main__":
    key = jax.random.PRNGKey(0)
    k1, k2 = jax.random.split(key)

    # NCHW inputs, as the PyTorch module would receive.
    x_shape = (2, 4, 16, 16)
    img1 = jax.random.normal(k1, x_shape, dtype=jnp.float32)
    img2 = jax.random.normal(k2, x_shape, dtype=jnp.float32)

    # Per-element distance map kernel (secondary API).
    out_map = jax.block_until_ready(welsch_loss_map(img1, img2, alpha=0.1, weight=1.0))
    ref_map = _reference_map(img1, img2, alpha=0.1, weight=1.0)
    assert out_map.shape == x_shape
    assert jnp.allclose(out_map, ref_map, atol=1e-6, rtol=1e-5), "map mismatch vs reference"

    # Module-level forward with the fused in-kernel reduction.
    loss = jax.block_until_ready(lpips_loss(img1, img2, loss_weight=1.0, alpha=0.1))
    ref_loss = jnp.mean(ref_map)
    assert jnp.allclose(loss, ref_loss, atol=1e-6, rtol=1e-5), "scalar loss mismatch vs reference"

    # bf16 inputs: kernel still accumulates in f32.
    loss_bf16 = jax.block_until_ready(
        lpips_loss(img1.astype(jnp.bfloat16), img2.astype(jnp.bfloat16),
                   loss_weight=1.0, alpha=0.1))
    ref_bf16 = jnp.mean(_reference_map(img1.astype(jnp.bfloat16),
                                       img2.astype(jnp.bfloat16)))
    assert jnp.allclose(loss_bf16, ref_bf16, atol=1e-3, rtol=1e-2), "bf16 loss mismatch"

    print("KERNEL_OK")
</pallas_src>

<mosaic_0001>
module attributes {stable_mosaic.version = 11 : i64} {
  func.func @_welsch_map_kernel(%arg0: i32, %arg1: memref<1x2048xf32, #tpu.memory_space<vmem>>, %arg2: memref<1x2048xf32, #tpu.memory_space<vmem>>, %arg3: memref<1x2048xf32, #tpu.memory_space<vmem>>) attributes {dimension_semantics = [#tpu.dimension_semantics<parallel>], iteration_bounds = array<i64: 1>, scalar_prefetch = 0 : i64, scratch_operands = 0 : i64, tpu.core_type = #tpu.core_type<tc>, window_params = [{transform_indices = @transform_0, window_bounds = array<i64: 1, 2048>}, {transform_indices = @transform_1, window_bounds = array<i64: 1, 2048>}, {transform_indices = @transform_2, window_bounds = array<i64: 1, 2048>}]} {
    %c0 = arith.constant 0 : index
    %c0_0 = arith.constant 0 : index
    %0 = vector.load %arg1[%c0, %c0_0] : memref<1x2048xf32, #tpu.memory_space<vmem>>, vector<1x2048xf32>
    %c0_1 = arith.constant 0 : index
    %c0_2 = arith.constant 0 : index
    %1 = vector.load %arg2[%c0_1, %c0_2] : memref<1x2048xf32, #tpu.memory_space<vmem>>, vector<1x2048xf32>
    %2 = arith.subf %0, %1 : vector<1x2048xf32>
    %3 = arith.mulf %2, %2 : vector<1x2048xf32>
    %cst = arith.constant -5.000000e+01 : f32
    %4 = vector.broadcast %cst : f32 to vector<1x2048xf32>
    %5 = arith.mulf %3, %4 : vector<1x2048xf32>
    %6 = math.exp %5 : vector<1x2048xf32>
    %cst_3 = arith.constant 1.000000e+00 : f32
    %7 = vector.broadcast %cst_3 : f32 to vector<1x2048xf32>
    %8 = arith.subf %7, %6 : vector<1x2048xf32>
    %cst_4 = arith.constant 0.00999999977 : f32
    %9 = vector.broadcast %cst_4 : f32 to vector<1x2048xf32>
    %10 = arith.mulf %9, %8 : vector<1x2048xf32>
    %c0_5 = arith.constant 0 : index
    %c0_6 = arith.constant 0 : index
    %11 = vector.load %arg3[%c0_5, %c0_6] : memref<1x2048xf32, #tpu.memory_space<vmem>>, vector<1x2048xf32>
    tpu.vector_store %arg3[%c0_5, %c0_6], %10 {strides = array<i32>} : memref<1x2048xf32, #tpu.memory_space<vmem>>, vector<1x2048xf32>,
    return
  }
  func.func @transform_0(%arg0: i32) -> (i32, i32) {
    %c0_i32 = arith.constant 0 : i32
    %c0_i32_0 = arith.constant 0 : i32
    return %arg0, %c0_i32 : i32, i32
  }
  func.func @transform_1(%arg0: i32) -> (i32, i32) {
    %c0_i32 = arith.constant 0 : i32
    %c0_i32_0 = arith.constant 0 : i32
    return %arg0, %c0_i32 : i32, i32
  }
  func.func @transform_2(%arg0: i32) -> (i32, i32) {
    %c0_i32 = arith.constant 0 : i32
    %c0_i32_0 = arith.constant 0 : i32
    return %arg0, %c0_i32 : i32, i32
  }
}

</mosaic_0001>

<bundles_post_ra>
// kernel: welsch_loss_map.1
= control target key start
LH: loop header
LB: loop body
LE: loop exit
PB: predicated region body
PF: predicated region fallthrough
CT: control target
= control target key end

     0   :  { %s72_s0 = inlined_call_operand.vmem [shape: f32[1,2048], index: 0, kind: input, shape index: {}]   ;;  %s73_s1 = inlined_call_operand.vmem [shape: f32[1,2048], index: 1, kind: input, shape index: {}]   ;;  %s74_s2 = inlined_call_operand.vmem [shape: f32[1,2048], index: 2, kind: output, shape index: {}]  }
   0x1   :  { %v11_v0 = vld [vmem:[%s72_s0] sm:$0xff]  ;;  %v12_v2 = vld [vmem:[%s72_s0 + $0x8] sm:$0xff] }
   0x2   :  { %v13_v1 = vld [vmem:[%s73_s1] sm:$0xff]  ;;  %v14_v4 = vld [vmem:[%s73_s1 + $0x8] sm:$0xff] }
   0x3   :  { %v15_v3 = vsub.f32 %v11_v0, %v13_v1  ;;  %v16_v5 = vsub.f32 %v12_v2, %v14_v4 }
   0x5   :  { %v17_v6 = vmul.f32 %v15_v3, %v15_v3  ;;  %v18_v7 = vmul.f32 %v16_v5, %v16_v5 }
   0x7   :  { %v19_v8 = vmul.f32 -50.0, %v17_v6  ;;  %v20_v9 = vmul.f32 -50.0, %v18_v7 }
   0x9   :  { %v21_v10 = vmul.f32 1.442695, %v19_v8  ;;  %v23_v11 = vmul.f32 1.442695, %v20_v9 }
   0xb   :  { %35 = vpow2.f32 %v21_v10 }
   0xc   :  { %37 = vpow2.f32 %v23_v11 }
  0x11   :  { %v36_v12 = vpop.eup %35 }
  0x12   :  { %v38_v13 = vpop.eup %37  ;;  %v25_v14 = vsub.f32 1.0, %v36_v12 }
  0x13   :  { %v26_v15 = vsub.f32 1.0, %v38_v13 }
  0x14   :  { %v27_v16 = vmul.f32 0.01, %v25_v14 }
  0x15   :  { %v28_v17 = vmul.f32 0.01, %v26_v15 }
  0x16   :  { %29 = vst [vmem:[%s74_s2] sm:$0xff] %v27_v16 }
  0x17   :  { %30 = vst [vmem:[%s74_s2 + $0x8] sm:$0xff] %v28_v17 }

</bundles_post_ra>
